<compile_context>
chip_gen: v6e
topology: v6e:2x2x1
jax: 0.10.0
libtpu: 0.0.40
codegen_flags: <defaults>
</compile_context>

<pallas_src>
import jax
import jax.numpy as jnp
from jax.experimental import pallas as pl
from jax.experimental.pallas import tpu as pltpu


def _pool_kernel(x_ref, sum_ref, max_ref):
    """Accumulate sum / running max over the HW (lane) axis across grid steps."""
    @pl.when(pl.program_id(0) == 0)
    def _init():
        sum_ref[...] = jnp.zeros_like(sum_ref)
        max_ref[...] = jnp.full_like(max_ref, -jnp.inf)

    x = x_ref[...]                                    # (B, C, t_hw) f32
    sum_ref[...] += jnp.sum(x, axis=-1)               # raw sums; 1/HW folded later
    max_ref[...] = jnp.maximum(max_ref[...], jnp.max(x, axis=-1))


def _apply_kernel(x_ref, scale_ref, o_ref):
    """Pure streaming gate apply: o = x * scale[:, :, None]."""
    o_ref[...] = x_ref[...] * scale_ref[...][:, :, None]


def _pick_hw_tile(batch, channels, hw):
    """Largest lane-dense HW tile that divides HW and fits the VMEM budget."""
    lane_cap = 1024
    try:
        # Halve the tile on parts with small per-core VMEM (e.g. v7x: 64 MiB/TC).
        if pltpu.get_tpu_info().vmem_capacity_bytes < (96 << 20):
            lane_cap = 512
    except Exception:
        pass
    max_block_bytes = 2 << 20                         # per-buffer budget
    bytes_per_lane = batch * channels * 4
    cap = min(lane_cap, max(128, max_block_bytes // bytes_per_lane))
    cap = (cap // 128) * 128
    if hw <= cap:
        return hw                                     # block == full dim: always legal
    if hw % 128 == 0:
        for t in range(cap, 127, -128):               # largest 128-multiple dividing HW
            if hw % t == 0:
                return t
    # TODO(synk): mask ragged HW tails (sum-pad 0 / max-pad -inf) instead of
    # falling back to one full-HW block.
    return hw


def channel_gate(x_nchw, w1, b1, w2, b2):
    """CBAM ChannelGate forward. x_nchw: (B, C, H, W) f32 -> (B, C, H, W)."""
    B, C, H, W = x_nchw.shape
    HW = H * W
    x = x_nchw.reshape(B, C, HW)

    t_hw = _pick_hw_tile(B, C, HW)
    n_hw = HW // t_hw
    assert n_hw * t_hw == HW

    # ---- pass 1: pooled raw-sum / max over HW (accumulator grid over HW) ----
    sum_pool, max_pool = pl.pallas_call(
        _pool_kernel,
        out_shape=(jax.ShapeDtypeStruct((B, C), jnp.float32),
                   jax.ShapeDtypeStruct((B, C), jnp.float32)),
        grid=(n_hw,),
        in_specs=[pl.BlockSpec((B, C, t_hw), lambda h: (0, 0, h))],
        out_specs=(pl.BlockSpec((B, C), lambda h: (0, 0)),
                   pl.BlockSpec((B, C), lambda h: (0, 0))),
        compiler_params=pltpu.CompilerParams(
            dimension_semantics=("arbitrary",),
            vmem_limit_bytes=32 << 20),
    )(x)

    # ---- tiny (B, C) MLP + sigmoid in plain JAX (too small for the MXU) ----
    avg_pool = sum_pool * (1.0 / HW)                       # fold 1/HW once
    pooled = jnp.concatenate([avg_pool, max_pool], axis=0)  # (2B, C): one fused matmul
    hidden = jnp.maximum(pooled @ w1 + b1, 0.0)
    att = hidden @ w2 + b2
    scale = jax.nn.sigmoid(att[:B] + att[B:])              # (B, C)

    # ---- pass 2: lane-dense streaming gate apply ----
    out = pl.pallas_call(
        _apply_kernel,
        out_shape=jax.ShapeDtypeStruct((B, C, HW), x.dtype),
        grid=(n_hw,),
        in_specs=[pl.BlockSpec((B, C, t_hw), lambda h: (0, 0, h)),
                  pl.BlockSpec((B, C), lambda h: (0, 0))],
        out_specs=pl.BlockSpec((B, C, t_hw), lambda h: (0, 0, h)),
        compiler_params=pltpu.CompilerParams(
            dimension_semantics=("parallel",),
            vmem_limit_bytes=32 << 20),
    )(x, scale.astype(x.dtype))

    return out.reshape(B, C, H, W)


if __name__ == "__main__":
    # gate_channels=32, reduction_ratio=4 -> hidden=8; modest spatial map so the
    # HW grid has several blocks and the accumulator path is exercised.
    B, C, H, W = 2, 32, 48, 48
    Ch = C // 4

    key = jax.random.PRNGKey(0)
    kx, k1, k2, k3, k4 = jax.random.split(key, 5)

    x = jax.random.normal(kx, (B, C, H, W), dtype=jnp.float32)
    # Deterministic synthetic parameters for nn.Linear(C, Ch) and nn.Linear(Ch, C).
    w1 = jax.random.normal(k1, (C, Ch), dtype=jnp.float32) * 0.1   # (in, hidden)
    b1 = jax.random.normal(k2, (Ch,), dtype=jnp.float32) * 0.1
    w2 = jax.random.normal(k3, (Ch, C), dtype=jnp.float32) * 0.1   # (hidden, out)
    b2 = jax.random.normal(k4, (C,), dtype=jnp.float32) * 0.1

    out = jax.block_until_ready(channel_gate(x, w1, b1, w2, b2))

    # Pure-JAX reference (avg/max pool -> shared MLP -> sum -> sigmoid -> scale).
    def ref(xv):
        avg_p = jnp.mean(xv, axis=(2, 3))
        max_p = jnp.max(xv, axis=(2, 3))
        mlp = lambda p: jnp.maximum(p @ w1 + b1, 0.0) @ w2 + b2
        att = mlp(avg_p) + mlp(max_p)
        return xv * jax.nn.sigmoid(att)[:, :, None, None]

    expected = ref(x)
    assert jnp.allclose(out, expected, atol=1e-4, rtol=1e-5), "mismatch vs reference"
    print("KERNEL_OK")
</pallas_src>

<mosaic_0001>
module attributes {stable_mosaic.version = 11 : i64} {
  func.func @_pool_kernel(%arg0: i32, %arg1: memref<2x32x768xf32, #tpu.memory_space<vmem>>, %arg2: memref<2x32xf32, #tpu.memory_space<vmem>>, %arg3: memref<2x32xf32, #tpu.memory_space<vmem>>) attributes {dimension_semantics = [#tpu.dimension_semantics<arbitrary>], iteration_bounds = array<i64: 3>, scalar_prefetch = 0 : i64, scratch_operands = 0 : i64, tpu.core_type = #tpu.core_type<tc>, window_params = [{transform_indices = @transform_0, window_bounds = array<i64: 2, 32, 768>}, {pipeline_mode = #tpu.pipeline_mode<synchronous>, transform_indices = @transform_1, window_bounds = array<i64: 2, 32>}, {pipeline_mode = #tpu.pipeline_mode<synchronous>, transform_indices = @transform_2, window_bounds = array<i64: 2, 32>}]} {
    %c0_i32 = arith.constant 0 : i32
    %0 = arith.cmpi eq, %arg0, %c0_i32 : i32
    %1 = arith.extui %0 : i1 to i32
    %c0_i32_0 = arith.constant 0 : i32
    %2 = arith.cmpi ne, %1, %c0_i32_0 : i32
    scf.if %2 {
      %cst_12 = arith.constant 0.000000e+00 : f32
      %12 = vector.broadcast %cst_12 : f32 to vector<2x32xf32>
      %c0_13 = arith.constant 0 : index
      %c0_14 = arith.constant 0 : index
      %13 = vector.load %arg2[%c0_13, %c0_14] : memref<2x32xf32, #tpu.memory_space<vmem>>, vector<2x32xf32>
      tpu.vector_store %arg2[%c0_13, %c0_14], %12 {strides = array<i32>} : memref<2x32xf32, #tpu.memory_space<vmem>>, vector<2x32xf32>,
      %cst_15 = arith.constant 0xFF800000 : f32
      %14 = vector.broadcast %cst_15 : f32 to vector<2x32xf32>
      %c0_16 = arith.constant 0 : index
      %c0_17 = arith.constant 0 : index
      %15 = vector.load %arg3[%c0_16, %c0_17] : memref<2x32xf32, #tpu.memory_space<vmem>>, vector<2x32xf32>
      tpu.vector_store %arg3[%c0_16, %c0_17], %14 {strides = array<i32>} : memref<2x32xf32, #tpu.memory_space<vmem>>, vector<2x32xf32>,
    } else {
    }
    %c0 = arith.constant 0 : index
    %c0_1 = arith.constant 0 : index
    %c0_2 = arith.constant 0 : index
    %3 = vector.load %arg1[%c0, %c0_1, %c0_2] : memref<2x32x768xf32, #tpu.memory_space<vmem>>, vector<2x32x768xf32>
    %c0_3 = arith.constant 0 : index
    %c0_4 = arith.constant 0 : index
    %4 = vector.load %arg2[%c0_3, %c0_4] : memref<2x32xf32, #tpu.memory_space<vmem>>, vector<2x32xf32>
    %cst = arith.constant dense<0.000000e+00> : vector<2x32xf32>
    %5 = vector.multi_reduction <add>, %3, %cst [2] : vector<2x32x768xf32> to vector<2x32xf32>
    %6 = arith.addf %4, %5 : vector<2x32xf32>
    %c0_5 = arith.constant 0 : index
    %c0_6 = arith.constant 0 : index
    %7 = vector.load %arg2[%c0_5, %c0_6] : memref<2x32xf32, #tpu.memory_space<vmem>>, vector<2x32xf32>
    tpu.vector_store %arg2[%c0_5, %c0_6], %6 {strides = array<i32>} : memref<2x32xf32, #tpu.memory_space<vmem>>, vector<2x32xf32>,
    %c0_7 = arith.constant 0 : index
    %c0_8 = arith.constant 0 : index
    %8 = vector.load %arg3[%c0_7, %c0_8] : memref<2x32xf32, #tpu.memory_space<vmem>>, vector<2x32xf32>
    %cst_9 = arith.constant dense<0xFF800000> : vector<2x32xf32>
    %9 = vector.multi_reduction <maximumf>, %3, %cst_9 [2] : vector<2x32x768xf32> to vector<2x32xf32>
    %10 = arith.maximumf %8, %9 : vector<2x32xf32>
    %c0_10 = arith.constant 0 : index
    %c0_11 = arith.constant 0 : index
    %11 = vector.load %arg3[%c0_10, %c0_11] : memref<2x32xf32, #tpu.memory_space<vmem>>, vector<2x32xf32>
    tpu.vector_store %arg3[%c0_10, %c0_11], %10 {strides = array<i32>} : memref<2x32xf32, #tpu.memory_space<vmem>>, vector<2x32xf32>,
    return
  }
  func.func @transform_0(%arg0: i32) -> (i32, i32, i32) {
    %c0_i32 = arith.constant 0 : i32
    %c0_i32_0 = arith.constant 0 : i32
    %c0_i32_1 = arith.constant 0 : i32
    return %c0_i32, %c0_i32_0, %arg0 : i32, i32, i32
  }
  func.func @transform_1(%arg0: i32) -> (i32, i32) {
    %c0_i32 = arith.constant 0 : i32
    %c0_i32_0 = arith.constant 0 : i32
    %c0_i32_1 = arith.constant 0 : i32
    return %c0_i32, %c0_i32_0 : i32, i32
  }
  func.func @transform_2(%arg0: i32) -> (i32, i32) {
    %c0_i32 = arith.constant 0 : i32
    %c0_i32_0 = arith.constant 0 : i32
    %c0_i32_1 = arith.constant 0 : i32
    return %c0_i32, %c0_i32_0 : i32, i32
  }
}

</mosaic_0001>

<bundles_post_ra>
// kernel: tpu_custom_call.1
= control target key start
LH: loop header
LB: loop body
LE: loop exit
PB: predicated region body
PF: predicated region fallthrough
CT: control target
= control target key end

     0   :  { %8 = vsyncpa [#allocation3], 0  ;;  %s928_s0 = inlined_call_operand.hbm [shape: f32[2,32,2304], index: 0, kind: input, shape index: {}]   ;;  %s929_s1 = inlined_call_operand.hbm [shape: f32[2,32], index: 1, kind: output, shape index: {0}]   ;;  %s930_s2 = inlined_call_operand.hbm [shape: f32[2,32], index: 2, kind: output, shape index: {1}]  }
   0x1   :  { %10 = vsyncpa [#allocation3 + $0x1], 0 }
   0x2   :  { %11 = vsyncpa [#allocation4], 0 }
   0x3   :  { %12 = vsyncpa [#allocation7], 0  ;;  %s724_s9 = smov 0   ;;  %s726_s10 = smov 0  }
   0x4   :  { %s728_s11 = smov 0   ;;  %s730_s12 = smov 0  }
   0x5 LB: > { %s743_s13 = sadd.s32 4294967295, %s699_s12   ;;  %s746_s14 = sadd.s32 1, %s699_s12   ;;  %s699_s12 = sphi %s730_s12, %s938_s12   ;;  %s695_s11 = sphi %s728_s11, %s937_s11   ;;  %s691_s10 = sphi %s726_s10, %s936_s10   ;;  %s687_s9 = sphi %s724_s9, %s935_s9  }
   0x6   : > { %s22_s15 = ssub.s32 %s699_s12, %s746_s14  ;;  %s25_s16 = sadd.s32 1, %s695_s11 }
   0x7   : > { %p23_p0 = scmp.eq.s32.totalorder %s22_s15, 0  ;;  %p32_p1 = scmp.ne.s32.totalorder %s695_s11, %s691_s10 }
   0x8   : > { %p33_p2 = scmp.eq.s32.totalorder %s699_s12, 0  ;;  %p38_p3 = scmp.ne.s32.totalorder %s691_s10, %s687_s9 }
   0x9   : > { %s756_s17 = scalar_select %p23_p0, %s695_s11, %s25_s16  }
   0xa   : > { %p34_p4 = por %p33_p2, %p32_p1  ;;  %p39_p5 = scmp.eq.s32.totalorder %s743_s13, 0 }
   0xb   : > { %p537_p6 = scmp.lt.s32.totalorder %s699_s12, 3  ;;  %s104_s19 = sand.u32 1, %s695_s11  }
   0xc   : > { %p760_p7 = por %p39_p5, %p38_p3  ;;  %s521_s20 = smul.u32 384, %s104_s19 }
   0xd   : > { %s520_s21 = smul.u32 768, %s699_s12  ;;  %p766_p8 = pnand %p537_p6, %p34_p4 }
   0xe   : > { %s932_s18 = scalar_select %p760_p7, 1, 0 }
   0xf   : > { %s773_s25 = scalar_lea.hbm %s928_s0, %s520_s21  ;;  %s108_s26 = scalar_lea.vmem [#allocation2], %s521_s20 }
  0x10   : > { %s115_s27 = sshll.u32 %s108_s26, 4  ;;  %s777_s28 = scalar_lea.sflag [#allocation3], %s104_s19  ;;  %s775_s27 = int_to_ptr.vmem [resolvable:$true] %s115_s27 }
  0x11   : > { %s581_s29 = scalar_lea.hbm %s773_s25, 6144  ;;  %p583_p10 = pneg %p766_p8 }
  0x12   : > { %p582_p9 = scmp.ne.s32.totalorder %s773_s25, %s581_s29  ;;  %s586_s4 = scalar_lea.hbm %s928_s0, 18432 }
  0x13   : > { %p587_p13 = scmp.lt.s32.totalorder %s773_s25, %s928_s0  ;;  %p588_p0 = scmp.lt.s32.totalorder %s586_s4, %s581_s29 }
  0x14   : > { %p584_p11 = pnand %p583_p10, %p582_p9 }
  0x15   : > { %p589_p1 = por %p588_p0, %p587_p13 }
  0x16   : > { %p585_p12 = pneg %p584_p11 }
  0x18   : > { %p590_p2 = pnand %p589_p1, %p585_p12 }
  0x1a   : > { %593 = shalt.err (!%p590_p2)
}
  0x1b   : > { %s594_s7 = scalar_lea.vmem %s775_s27, 6144  ;;  %s701_s8 = smov [#allocation2]  }
  0x1c   : > { %p595_p3 = scmp.ne.s32.totalorder %s775_s27, %s594_s7  ;;  %s599_s9 = sshll.u32 %s701_s8, 4  ;;  %s600_s9 = int_to_ptr.vmem [resolvable:$false] %s599_s9 }
  0x1d   : > { %s601_s15 = scalar_lea.vmem %s600_s9, 12288  ;;  %p602_p6 = scmp.lt.s32.totalorder %s775_s27, %s600_s9 }
  0x1e   : > { %p597_p4 = pnand %p595_p3, %p583_p10  ;;  %p603_p9 = scmp.lt.s32.totalorder %s601_s15, %s594_s7 }
  0x20   : > { %p598_p5 = pneg %p597_p4  ;;  %p604_p11 = por %p603_p9, %p602_p6 }
  0x22   : > { %p605_p7 = pnand %p604_p11, %p598_p5 }
  0x24   : > { %608 = shalt.err (!%p605_p7)
}
  0x25   : > { %s702_s16 = smov 2304   ;;  %s703_s19 = smov 768  }
  0x26   : > { %s704_s20 = smov 48   ;;  %p512_p10 = scmp.ge.s32.totalorder %s699_s12, 1 }
  0x27   : > { %536 = dma.hbm_to_vmem [thread:$0]  (!%p766_p8), %s773_s25, 6144, %s775_s27, %s777_s28, %s702_s16, %s703_s19, %s704_s20  }
  0x28   : > { %p123_p12 = scmp.lt.s32.totalorder %s699_s12, 4 }
  0x2a   : > { %p124_p13 = pnand %p512_p10, %p123_p12 }
  0x2b   : > { %s129_s21 = sand.u32 (!%p124_p13), 1, %s691_s10   ;;  %p934_p7 = scmp.ne.s32.totalorder (!%p124_p13), %s932_s18, 0 }
  0x2c   : > { %127 = sbr.rel (%p124_p13) target bundleno = 257 (0x101), region = 24  ;;  %s130_s24 = scalar_lea.sflag (!%p124_p13), [#allocation3], %s129_s21 }
  0x2d   : > { %s522_s23 = smul.u32 (!%p124_p13), 384, %s129_s21 }
  0x2f   : > { %s801_s26 = scalar_lea.vmem (!%p124_p13), [#allocation2], %s522_s23 }
  0x31   : > { %674 = dma.done.wait (%p934_p7), %s130_s24, 6144  }
  0x32   : > { %676 = vsyncadd (%p934_p7), %s130_s24, 4294961152  ;;  %p513_p0 = scmp.ne.s32.totalorder %s743_s13, 0 }
  0x34   : > { %153 = sbr.rel (%p513_p0) target bundleno = 59 (0x3b), region = 32 }
  0x39   : > { %vm154_vm0 = vcmask 254976   ;;  %v705_v0 = vmov 0.0   ;;  %v706_v1 = vmov -inf  }
  0x3a   : > { %155 = vst.msk [vmem:[#allocation5] sm:$0x3] %vm154_vm0, %v705_v0  ;;  %156 = vst.msk [vmem:[#allocation6] sm:$0x3] %vm154_vm0, %v706_v1 }
  0x3b PF: > { %v181_v2 = vld [vmem:[%s801_s26 + $0xc0] sm:$0xff]  ;;  %v182_v3 = vld [vmem:[%s801_s26 + $0xc8] sm:$0xff]  ;;  %v183_v4 = vld [vmem:[%s801_s26 + $0xd0] sm:$0xff]  ;;  %vm281_vm1 = vcmask 130112   ;;  %vm288_vm2 = vcmask 195712   ;;  %vm295_vm3 = vcmask 261312  }
  0x3c   : > { %v812_v5 = vld [vmem:[%s801_s26 + $0xd8] sm:$0xff]  ;;  %v234_v6 = vadd.f32 %v182_v3, %v181_v2  ;;  %v157_v7 = vld [vmem:[%s801_s26] sm:$0xff]  ;;  %v158_v8 = vld [vmem:[%s801_s26 + $0x8] sm:$0xff]  ;;  %v351_v18 = vmax.f32 %v181_v2, %v182_v3  ;;  %vm316_vm4 = vcmask 1041409   ;;  %s707_s12 = smov [#allocation5]   ;;  %vm320_vm5 = vcmask 254976  }
  0x3d   : > { %v159_v9 = vld [vmem:[%s801_s26 + $0x10] sm:$0xff]  ;;  %v818_v10 = vld [vmem:[%s801_s26 + $0xe0] sm:$0xff]  ;;  %v160_v12 = vld [vmem:[%s801_s26 + $0x18] sm:$0xff]  ;;  %v206_v13 = vadd.f32 %v158_v8, %v157_v7  ;;  %v323_v14 = vmax.f32 %v157_v7, %v158_v8  ;;  %s436_s18 = sshll.u32 %s707_s12, 4  ;;  %p538_p8 = scmp.eq.s32.totalorder %s743_s13, 2  ;;  %s437_s18 = int_to_ptr.vmem [resolvable:$true] %s436_s18 }
  0x3e   : > { %v235_v11 = vadd.f32 %v234_v6, %v183_v4  ;;  %v187_v15 = vld [vmem:[%s801_s26 + $0xf0] sm:$0xff]  ;;  %v188_v16 = vld [vmem:[%s801_s26 + $0xf8] sm:$0xff]  ;;  %v189_v17 = vld [vmem:[%s801_s26 + $0x100] sm:$0xff]  ;;  %v352_v40 = vmax.f32 %v351_v18, %v183_v4  ;;  %s708_s22 = smov [#allocation6]   ;;  %s609_s27 = scalar_lea.vmem %s437_s18, 32 }
  0x3f   : > { %v825_v19 = vld [vmem:[%s801_s26 + $0xe8] sm:$0xff]  ;;  %v161_v21 = vld [vmem:[%s801_s26 + $0x20] sm:$0xff]  ;;  %v207_v22 = vadd.f32 %v206_v13, %v159_v9  ;;  %v241_v24 = vadd.f32 %v188_v16, %v187_v15  ;;  %v324_v25 = vmax.f32 %v323_v14, %v159_v9  ;;  %v163_v26 = vld [vmem:[%s801_s26 + $0x30] sm:$0xff]  ;;  %v358_v29 = vmax.f32 %v187_v15, %v188_v16  ;;  %s447_s25 = sshll.u32 %s708_s22, 4  ;;  %p610_p1 = scmp.ne.s32.totalorder %s437_s18, %s609_s27  ;;  %s448_s25 = int_to_ptr.vmem [resolvable:$true] %s447_s25 }
  0x40   : > { %v236_v20 = vadd.f32 %v235_v11, %v812_v5  ;;  %v190_v23 = vld [vmem:[%s801_s26 + $0x108] sm:$0xff]  ;;  %v164_v27 = vld [vmem:[%s801_s26 + $0x38] sm:$0xff]  ;;  %v165_v28 = vld [vmem:[%s801_s26 + $0x40] sm:$0xff]  ;;  %v353_v62 = vmax.f32 %v352_v40, %v812_v5  ;;  %p616_p4 = scmp.lt.s32.totalorder %s437_s18, %s437_s18  ;;  %p617_p5 = scmp.lt.s32.totalorder %s609_s27, %s609_s27 }
  0x41   : > { %v835_v31 = vld [vmem:[%s801_s26 + $0x28] sm:$0xff]  ;;  %v208_v32 = vadd.f32 %v207_v22, %v160_v12  ;;  %v191_v33 = vld [vmem:[%s801_s26 + $0x110] sm:$0xff]  ;;  %v242_v34 = vadd.f32 %v241_v24, %v189_v17  ;;  %v213_v35 = vadd.f32 %v164_v27, %v163_v26  ;;  %v330_v37 = vmax.f32 %v163_v26, %v164_v27  ;;  %v193_v41 = vld [vmem:[%s801_s26 + $0x120] sm:$0xff]  ;;  %p611_p2 = pnand %p610_p1, %p538_p8 }
  0x42   : > { %v237_v30 = vadd.f32 %v236_v20, %v818_v10  ;;  %v166_v36 = vld [vmem:[%s801_s26 + $0x48] sm:$0xff]  ;;  %v325_v38 = vmax.f32 %v324_v25, %v160_v12  ;;  %v359_v39 = vmax.f32 %v358_v29, %v189_v17  ;;  %v843_v45 = vld [vmem:[%s801_s26 + $0x118] sm:$0xff]  ;;  %v167_v47 = vld [vmem:[%s801_s26 + $0x50] sm:$0xff]  ;;  %p618_p6 = por %p617_p5, %p616_p4 }
  0x43   : > { %v194_v42 = vld [vmem:[%s801_s26 + $0x128] sm:$0xff]  ;;  %v209_v44 = vadd.f32 %v208_v32, %v161_v21  ;;  %v243_v46 = vadd.f32 %v242_v34, %v190_v23  ;;  %v214_v48 = vadd.f32 %v213_v35, %v165_v28  ;;  %v331_v49 = vmax.f32 %v330_v37, %v165_v28  ;;  %v195_v51 = vld [vmem:[%s801_s26 + $0x130] sm:$0xff]  ;;  %v169_v52 = vld [vmem:[%s801_s26 + $0x60] sm:$0xff]  ;;  %p612_p3 = pneg %p611_p2 }
  0x44   : > { %v238_v43 = vadd.f32 %v237_v30, %v825_v19  ;;  %v360_v50 = vmax.f32 %v359_v39, %v190_v23  ;;  %v170_v53 = vld [vmem:[%s801_s26 + $0x68] sm:$0xff]  ;;  %v168_v56 = vld [vmem:[%s801_s26 + $0x58] sm:$0xff]  ;;  %v248_v58 = vadd.f32 %v194_v42, %v193_v41  ;;  %v171_v59 = vld [vmem:[%s801_s26 + $0x70] sm:$0xff]  ;;  %v326_v61 = vmax.f32 %v325_v38, %v161_v21 }
  0x45   : > { %v210_v54 = vadd.f32 %v209_v44, %v835_v31  ;;  %v244_v55 = vadd.f32 %v243_v46, %v191_v33  ;;  %v215_v57 = vadd.f32 %v214_v48, %v166_v36  ;;  %v332_v60 = vmax.f32 %v331_v49, %v166_v36  ;;  %v196_v63 = vld [vmem:[%s801_s26 + $0x138] sm:$0xff]  ;;  %v199_v1 = vld [vmem:[%s801_s26 + $0x150] sm:$0xff]  ;;  %v197_v22 = vld [vmem:[%s801_s26 + $0x140] sm:$0xff]  ;;  %p619_p9 = pnand %p618_p6, %p612_p3 }
  0x46   : > { %239 = vadd.xlane.f32.xlu1 %v238_v43  ;;  %v220_v0 = vadd.f32 %v170_v53, %v169_v52  ;;  %v200_v2 = vld [vmem:[%s801_s26 + $0x158] sm:$0xff]  ;;  %v249_v6 = vadd.f32 %v248_v58, %v195_v51  ;;  %v365_v7 = vmax.f32 %v193_v41, %v194_v42  ;;  %v361_v9 = vmax.f32 %v360_v50, %v191_v33  ;;  %v175_v14 = vld [vmem:[%s801_s26 + $0x90] sm:$0xff]  ;;  %v201_v23 = vld [vmem:[%s801_s26 + $0x160] sm:$0xff] }
  0x47   : > { %211 = vadd.xlane.f32.xlu0 %v210_v54  ;;  %v245_v3 = vadd.f32 %v244_v55, %v843_v45  ;;  %v216_v4 = vadd.f32 %v215_v57, %v167_v47  ;;  %v333_v8 = vmax.f32 %v332_v60, %v167_v47  ;;  %v172_v11 = vld [vmem:[%s801_s26 + $0x78] sm:$0xff]  ;;  %v337_v13 = vmax.f32 %v169_v52, %v170_v53  ;;  %v173_v29 = vld [vmem:[%s801_s26 + $0x80] sm:$0xff]  ;;  %v198_v36 = vld [vmem:[%s801_s26 + $0x148] sm:$0xff] }
  0x48   : > { %v221_v12 = vadd.f32 %v220_v0, %v171_v59  ;;  %v176_v5 = vld [vmem:[%s801_s26 + $0x98] sm:$0xff]  ;;  %v250_v16 = vadd.f32 %v249_v6, %v196_v63  ;;  %v366_v17 = vmax.f32 %v365_v7, %v195_v51  ;;  %v255_v18 = vadd.f32 %v200_v2, %v199_v1  ;;  %v177_v30 = vld [vmem:[%s801_s26 + $0xa0] sm:$0xff]  ;;  %v202_v37 = vld [vmem:[%s801_s26 + $0x168] sm:$0xff] }
  0x49   : > { %v217_v15 = vadd.f32 %v216_v4, %v168_v56  ;;  %v334_v20 = vmax.f32 %v333_v8, %v168_v56  ;;  %v354_v21 = vmax.f32 %v353_v62, %v818_v10  ;;  %v327_v24 = vmax.f32 %v326_v61, %v835_v31  ;;  %v174_v41 = vld [vmem:[%s801_s26 + $0x88] sm:$0xff]  ;;  %v203_v47 = vld [vmem:[%s801_s26 + $0x170] sm:$0xff]  ;;  %v204_v55 = vld [vmem:[%s801_s26 + $0x178] sm:$0xff] }
  0x4a   : > { %246 = vadd.xlane.f32.xlu1 %v245_v3  ;;  %v222_v25 = vadd.f32 %v221_v12, %v172_v11  ;;  %v338_v26 = vmax.f32 %v337_v13, %v171_v59  ;;  %v227_v27 = vadd.f32 %v176_v5, %v175_v14  ;;  %v362_v28 = vmax.f32 %v361_v9, %v843_v45  ;;  %v178_v42 = vld [vmem:[%s801_s26 + $0xa8] sm:$0xff]  ;;  %v179_v51 = vld [vmem:[%s801_s26 + $0xb0] sm:$0xff]  ;;  %v180_v59 = vld [vmem:[%s801_s26 + $0xb8] sm:$0xff] }
  0x4b   : > { %218 = vadd.xlane.f32.xlu0 %v217_v15  ;;  %v251_v32 = vadd.f32 %v250_v16, %v197_v22  ;;  %v367_v33 = vmax.f32 %v366_v17, %v196_v63  ;;  %v256_v10 = vadd.f32 %v255_v18, %v201_v23  ;;  %v372_v34 = vmax.f32 %v199_v1, %v200_v2 }
  0x4c   : > { %v355_v35 = vmax.f32 %v354_v21, %v825_v19  ;;  %v223_v31 = vadd.f32 %v222_v25, %v173_v29  ;;  %v339_v38 = vmax.f32 %v338_v26, %v172_v11  ;;  %v228_v39 = vadd.f32 %v227_v27, %v177_v30 }
  0x4d   : > { %v344_v40 = vmax.f32 %v175_v14, %v176_v5  ;;  %v252_v43 = vadd.f32 %v251_v32, %v198_v36  ;;  %v368_v44 = vmax.f32 %v367_v33, %v197_v22  ;;  %v257_v45 = vadd.f32 %v256_v10, %v202_v37 }
  0x4e   : > { %335 = vmax.xlane.f32.xlu1 %v334_v20  ;;  %v373_v46 = vmax.f32 %v372_v34, %v201_v23  ;;  %v224_v19 = vadd.f32 %v223_v31, %v174_v41  ;;  %v340_v48 = vmax.f32 %v339_v38, %v173_v29  ;;  %v229_v49 = vadd.f32 %v228_v39, %v178_v42 }
  0x4f   : > { %328 = vmax.xlane.f32.xlu0 %v327_v24  ;;  %v345_v50 = vmax.f32 %v344_v40, %v177_v30  ;;  %v369_v52 = vmax.f32 %v368_v44, %v198_v36  ;;  %v258_v53 = vadd.f32 %v257_v45, %v203_v47  ;;  %v270_v7 = vlaneseq }
  0x50   : > { %v374_v54 = vmax.f32 %v373_v46, %v202_v37  ;;  %v341_v56 = vmax.f32 %v340_v48, %v174_v41  ;;  %v230_v57 = vadd.f32 %v229_v49, %v179_v51 }
  0x51   : > { %v346_v58 = vmax.f32 %v345_v50, %v178_v42  ;;  %v259_v60 = vadd.f32 %v258_v53, %v204_v55  ;;  %v271_v11 = vand.u32 127, %v270_v7  ;;  %v273_v15 = vshrl.u32 %v270_v7, 7 }
  0x52   : > { %363 = vmax.xlane.f32.xlu1 %v362_v28  ;;  %v375_v61 = vmax.f32 %v374_v54, %v203_v47  ;;  %v231_v62 = vadd.f32 %v230_v57, %v180_v59  ;;  %v205_v47 = vld [vmem:[#allocation5] sm:$0x3] }
  0x53   : > { %356 = vmax.xlane.f32.xlu0 %v355_v35  ;;  %v347_v63 = vmax.f32 %v346_v58, %v179_v51  ;;  %v276_v13 = vadd.s32 4294967288, %v271_v11  ;;  %v283_v5 = vadd.s32 4294967280, %v271_v11  ;;  %v290_v18 = vadd.s32 4294967272, %v271_v11  ;;  %v322_v58 = vld [vmem:[#allocation6] sm:$0x3] }
  0x54   : > { %v376_v0 = vmax.f32 %v375_v61, %v204_v55  ;;  %v274_v22 = vsub.s32 %v271_v11, %v273_v15 }
  0x55   : > { %v348_v1 = vmax.f32 %v347_v63, %v180_v59  ;;  %v279_v17 = vsub.s32 %v276_v13, %v273_v15  ;;  %v286_v20 = vsub.s32 %v283_v5, %v273_v15  ;;  %v293_v25 = vsub.s32 %v290_v18, %v273_v15 }
  0x56   : > { %253 = vadd.xlane.f32.xlu1 %v252_v43 }
  0x57   : > { %225 = vadd.xlane.f32.xlu0 %v224_v19 }
  0x5a   : > { %370 = vmax.xlane.f32.xlu1 %v369_v52 }
  0x5b   : > { %342 = vmax.xlane.f32.xlu0 %v341_v56 }
  0x5e   : > { %260 = vadd.xlane.f32.xlu1 %v259_v60 }
  0x5f   : > { %232 = vadd.xlane.f32.xlu0 %v231_v62 }
  0x62   : > { %377 = vmax.xlane.f32.xlu1 %v376_v0 }
  0x63   : > { %349 = vmax.xlane.f32.xlu0 %v348_v1 }
  0xcf   : > { %v240_v2 = vpop.xlane.xlu1 %239 }
  0xd0   : > { %v212_v3 = vpop.xlane.xlu0 %211  ;;  %v300_v29 = vrot.slane %v240_v2, %v274_v22 }
  0xd1   : > { %v275_v30 = vrot.slane %v212_v3, %v274_v22 }
  0xd3   : > { %v247_v4 = vpop.xlane.xlu1 %246 }
  0xd4   : > { %v219_v6 = vpop.xlane.xlu0 %218  ;;  %v304_v24 = vrot.slane %v247_v4, %v279_v17 }
  0xd5   : > { %v280_v26 = vrot.slane %v219_v6, %v279_v17 }
  0xd6   : > { %v305_v10 = vsel %vm281_vm1, %v304_v24, %v300_v29 }
  0xd7   : > { %v336_v8 = vpop.xlane.xlu1 %335  ;;  %v282_v37 = vsel %vm281_vm1, %v280_v26, %v275_v30 }
  0xd8   : > { %v329_v9 = vpop.xlane.xlu0 %328  ;;  %v394_v40 = vrot.slane %v336_v8, %v279_v17 }
  0xd9   : > { %v390_v41 = vrot.slane %v329_v9, %v274_v22 }
  0xdb   : > { %v364_v12 = vpop.xlane.xlu1 %363  ;;  %v395_v53 = vsel %vm281_vm1, %v394_v40, %v390_v41 }
  0xdc   : > { %v357_v14 = vpop.xlane.xlu0 %356  ;;  %v413_v34 = vrot.slane %v364_v12, %v279_v17 }
  0xdd   : > { %v409_v35 = vrot.slane %v357_v14, %v274_v22 }
  0xdf   : > { %v254_v16 = vpop.xlane.xlu1 %253  ;;  %v414_v19 = vsel %vm281_vm1, %v413_v34, %v409_v35 }
  0xe0   : > { %v226_v21 = vpop.xlane.xlu0 %225  ;;  %v309_v27 = vrot.slane %v254_v16, %v286_v20 }
  0xe1   : > { %v287_v32 = vrot.slane %v226_v21, %v286_v20 }
  0xe2   : > { %v310_v31 = vsel %vm288_vm2, %v309_v27, %v305_v10 }
  0xe3   : > { %v371_v23 = vpop.xlane.xlu1 %370  ;;  %v289_v44 = vsel %vm288_vm2, %v287_v32, %v282_v37 }
  0xe4   : > { %v343_v28 = vpop.xlane.xlu0 %342  ;;  %v418_v38 = vrot.slane %v371_v23, %v286_v20 }
  0xe5   : > { %v399_v45 = vrot.slane %v343_v28, %v286_v20 }
  0xe6   : > { %v419_v50 = vsel %vm288_vm2, %v418_v38, %v414_v19 }
  0xe7   : > { %v261_v33 = vpop.xlane.xlu1 %260  ;;  %v400_v57 = vsel %vm288_vm2, %v399_v45, %v395_v53 }
  0xe8   : > { %v314_v36 = vrot.slane %v261_v33, %v293_v25  ;;  %v233_v39 = vpop.xlane.xlu0 %232 }
  0xe9   : > { %v294_v43 = vrot.slane %v233_v39, %v293_v25 }
  0xea   : > { %v315_v42 = vsel %vm295_vm3, %v314_v36, %v310_v31 }
  0xeb   : > { %v378_v46 = vpop.xlane.xlu1 %377  ;;  %v296_v48 = vsel %vm295_vm3, %v294_v43, %v289_v44 }
  0xec   : > { %v423_v49 = vrot.slane %v378_v46, %v293_v25  ;;  %v350_v51 = vpop.xlane.xlu0 %349  ;;  %v317_v52 = vsel %vm316_vm4, %v315_v42, %v296_v48 }
  0xed   : > { %v404_v55 = vrot.slane %v350_v51, %v293_v25  ;;  %v319_v56 = vadd.f32 %v317_v52, %v205_v47 }
  0xee   : > { %v424_v54 = vsel %vm295_vm3, %v423_v49, %v419_v50 }
  0xef   : > { %v405_v59 = vsel %vm295_vm3, %v404_v55, %v400_v57  ;;  %321 = vst.msk [vmem:[#allocation5] sm:$0x3] %vm320_vm5, %v319_v56 }
  0xf0   : > { %622 = shalt.err (!%p619_p9)
}
  0xf1   : > { %526 = dma.vmem_to_hbm [thread:$0]  (%p538_p8), %s437_s18, 32, %s929_s1, [#allocation4]   ;;  %v425_v60 = vsel %vm316_vm4, %v424_v54, %v405_v59 }
  0xf2   : > { %v427_v61 = vmax.f32 %v322_v58, %v425_v60  ;;  %s633_s30 = scalar_lea.vmem %s448_s25, 32  ;;  %p640_p13 = scmp.lt.s32.totalorder %s448_s25, %s448_s25 }
  0xf3   : > { %p634_p11 = scmp.ne.s32.totalorder %s448_s25, %s633_s30  ;;  %p641_p7 = scmp.lt.s32.totalorder %s633_s30, %s633_s30 }
  0xf4   : > { %428 = vst.msk [vmem:[#allocation6] sm:$0x3] %vm320_vm5, %v427_v61 }
  0xf5   : > { %p635_p10 = pnand %p634_p11, %p538_p8  ;;  %p642_p0 = por %p641_p7, %p640_p13 }
  0xf7   : > { %p636_p12 = pneg %p635_p10 }
  0xf9   : > { %p643_p1 = pnand %p642_p0, %p636_p12 }
  0xfb   : > { %646 = shalt.err (!%p643_p1)
}
  0xfc   : > { %528 = dma.vmem_to_hbm [thread:$0]  (%p538_p8), %s448_s25, 32, %s930_s2, [#allocation7]  }
  0xfd   : > { %678 = dma.done.wait (%p538_p8), [#allocation4], 32  }
  0xfe   : > { %680 = vsyncadd (%p538_p8), [#allocation4], 4294967264 }
  0xff   : > { %682 = dma.done.wait (%p538_p8), [#allocation7], 32  }
 0x100   : > { %684 = vsyncadd (%p538_p8), [#allocation7], 4294967264 }
 0x101 PF: > { %p15_p2 = scmp.ge.s32.totalorder %s746_s14, 5   ;;  %s935_s9 = smov %s691_s10 }
 0x102   : > { %s936_s10 = smov %s695_s11  ;;  %s937_s11 = smov %s756_s17 }
 0x103   : > { %s938_s12 = smov %s746_s14  ;;  %17 = sbr.rel (!%p15_p2) target bundleno = 5 (0x5), region = 73 }
 0x108   :  { %464 = vsyncpa [#allocation3], 1 }
 0x109   :  { %466 = vsyncpa [#allocation3 + $0x1], 1 }
 0x10a   :  { %467 = vsyncpa [#allocation4], 1 }
 0x10b   :  { %469 = vsyncpa [#allocation4 + $0x1], 1 }
 0x10c   :  { %470 = vsyncpa [#allocation7], 1 }

</bundles_post_ra>
